<compile_context>
chip_gen: v7x
topology: tpu7x:2x2x1
jax: 0.10.0
libtpu: 0.0.40
codegen_flags: <defaults>
</compile_context>

<pallas_src>
import math
import functools

import jax
import jax.numpy as jnp
from jax.experimental import pallas as pl
from jax.experimental.pallas import tpu as pltpu


def _pick_tile(L, target):
    """Largest tile <= target that divides L and is a multiple of 8 (else full L)."""
    if L <= target:
        return L
    for t in range(target, 7, -1):
        if L % t == 0 and t % 8 == 0:
            return t
    return L


# ---------------------------------------------------------------------------
# Projection kernel: x @ W -> head-major bf16 (B, n_head, L, dh).
# Hoisted out of the attention kernel so K/V are projected exactly once
# (previously re-projected for every q-tile) and done as one fused matmul.
# ---------------------------------------------------------------------------
def _proj_kernel(x_ref, w_ref, o_ref, *, n_head, dh, scale):
    x = x_ref[0]                                   # (tl, d_model) f32
    if scale != 1.0:                               # fold 1/sqrt(d_model) into Q once
        x = x * scale
    x = x.astype(jnp.bfloat16)
    p = jnp.dot(x, w_ref[...], preferred_element_type=jnp.float32)   # (tl, d_out) f32
    # Head split = contiguous feature chunks (torch.tensor_split along dim=2):
    # static loop of lane-slice stores only (no large live temporaries).
    for h in range(n_head):
        o_ref[0, h] = p[:, h * dh:(h + 1) * dh].astype(jnp.bfloat16)


def _project_heads(x, w_bf16, *, n_head, dh, scale):
    B, L, d_model = x.shape
    tl = _pick_tile(L, 256)
    return pl.pallas_call(
        functools.partial(_proj_kernel, n_head=n_head, dh=dh, scale=scale),
        out_shape=jax.ShapeDtypeStruct((B, n_head, L, dh), jnp.bfloat16),
        grid=(B, L // tl),
        in_specs=[
            pl.BlockSpec((1, tl, d_model), lambda b, i: (b, i, 0)),
            pl.BlockSpec((d_model, n_head * dh), lambda b, i: (0, 0)),
        ],
        out_specs=pl.BlockSpec((1, n_head, tl, dh), lambda b, i: (b, 0, i, 0)),
        compiler_params=pltpu.CompilerParams(
            dimension_semantics=("parallel", "parallel"),
            vmem_limit_bytes=32 * 1024 * 1024,
        ),
    )(x, w_bf16)


# ---------------------------------------------------------------------------
# Attention kernel: flash-style online softmax over Lk tiles, heads batched,
# fused concat + output projection + residual + LayerNorm at the last Lk step.
# ---------------------------------------------------------------------------
def _attn_kernel(qh_ref, kh_ref, vh_ref, mask_ref, res_ref,
                 wp_ref, bp_ref, gamma_ref, beta_ref,
                 o_ref,
                 m_s, l_s, acc_s, cat_s,
                 *, n_head, dhv):
    f32 = jnp.float32
    bf16 = jnp.bfloat16
    kv = pl.program_id(2)

    @pl.when(kv == 0)
    def _():
        m_s[...] = jnp.full(m_s.shape, -jnp.inf, dtype=f32)
        l_s[...] = jnp.zeros(l_s.shape, dtype=f32)
        acc_s[...] = jnp.zeros(acc_s.shape, dtype=f32)

    qh = qh_ref[0]            # (n_head, tq, dhk) bf16, pre-scaled by 1/sqrt(d_model)
    kh = kh_ref[0]            # (n_head, tk, dhk) bf16
    vh = vh_ref[0]            # (n_head, tk, dhv) bf16

    # Batched-over-heads scores; contract the head dim directly (no transpose).
    s = jnp.einsum('hqd,hkd->hqk', qh, kh, preferred_element_type=f32)

    # Exact masked_fill(-1e9), matching the reference (mask nonzero == masked).
    masked = (mask_ref[0].astype(f32) != 0.0)[None, :, :]            # (1, tq, tk)
    s = jnp.where(masked, f32(-1e9), s)

    # Online (flash) softmax update; statistics in f32, exp in bf16
    # (bf16 EUP on v6e/v7x; the PV matmul consumes bf16 anyway).
    m_prev = m_s[...]
    m_new = jnp.maximum(m_prev, jnp.max(s, axis=-1, keepdims=True))  # (n_head, tq, 1)
    alpha = jnp.exp(m_prev - m_new)                                  # f32
    p = jnp.exp((s - m_new).astype(bf16))                            # (n_head, tq, tk) bf16
    l_s[...] = alpha * l_s[...] + jnp.sum(p.astype(f32), axis=-1, keepdims=True)
    acc_s[...] = alpha * acc_s[...] + jnp.einsum('hqk,hkd->hqd', p, vh,
                                                 preferred_element_type=f32)
    m_s[...] = m_new

    @pl.when(kv == pl.num_programs(2) - 1)
    def _():
        # Normalize (deferred softmax divide), tiny tensor -> exact reciprocal.
        inv_l = pl.reciprocal(l_s[...], approx=False)                # (n_head, tq, 1)
        head_out = (acc_s[...] * inv_l).astype(bf16)                 # (n_head, tq, dhv)

        # concat_head into a (tq, d_v) scratch, then ONE K=d_v projection matmul.
        for h in range(n_head):
            cat_s[:, h * dhv:(h + 1) * dhv] = head_out[h]
        proj = jnp.dot(cat_s[...], wp_ref[...], preferred_element_type=f32)  # (tq, d_model)

        # dropout = identity (eval); residual add + LayerNorm (centered variance).
        x = proj + bp_ref[0] + res_ref[0]
        mean = jnp.mean(x, axis=-1, keepdims=True)
        xc = x - mean
        var = jnp.mean(xc * xc, axis=-1, keepdims=True)
        y = xc * jax.lax.rsqrt(var + 1e-5)
        o_ref[0] = (y * gamma_ref[0] + beta_ref[0]).astype(o_ref.dtype)


def multi_head_attention(q, k, v, attn_mask, params, *, n_head):
    """q,k,v: [B, L, d_model] f32; attn_mask: [B, Lq, Lk] (nonzero == masked)."""
    B, Lq, d_model = q.shape
    Lk = k.shape[1]
    d_k = params["wq"].shape[1]
    d_v = params["wv"].shape[1]
    dhk = d_k // n_head
    dhv = d_v // n_head
    scale = 1.0 / math.sqrt(float(d_model))

    wq = params["wq"].astype(jnp.bfloat16)
    wk = params["wk"].astype(jnp.bfloat16)
    wv = params["wv"].astype(jnp.bfloat16)
    wp = params["wp"].astype(jnp.bfloat16)

    # Hoisted projections (separate pallas_calls): head-major bf16 (B, n_head, L, dh).
    qh = _project_heads(q, wq, n_head=n_head, dh=dhk, scale=scale)
    kh = _project_heads(k, wk, n_head=n_head, dh=dhk, scale=1.0)
    vh = _project_heads(v, wv, n_head=n_head, dh=dhv, scale=1.0)

    # int8 mask stream (4x fewer HBM bytes than f32); any nonzero value masks.
    mask_i8 = (attn_mask != 0).astype(jnp.int8)

    tq = _pick_tile(Lq, 256)
    # v7x has 2 TensorCores: make sure the parallel grid axes have >= 2 steps.
    while B * (Lq // tq) < 2 and tq % 16 == 0 and Lq % (tq // 2) == 0:
        tq //= 2
    tk = _pick_tile(Lk, 256)

    kernel = functools.partial(_attn_kernel, n_head=n_head, dhv=dhv)

    return pl.pallas_call(
        kernel,
        out_shape=jax.ShapeDtypeStruct((B, Lq, d_model), jnp.float32),
        grid=(B, Lq // tq, Lk // tk),
        in_specs=[
            pl.BlockSpec((1, n_head, tq, dhk), lambda b, i, j: (b, 0, i, 0)),   # qh
            pl.BlockSpec((1, n_head, tk, dhk), lambda b, i, j: (b, 0, j, 0)),   # kh
            pl.BlockSpec((1, n_head, tk, dhv), lambda b, i, j: (b, 0, j, 0)),   # vh
            pl.BlockSpec((1, tq, tk), lambda b, i, j: (b, i, j)),               # mask (int8)
            pl.BlockSpec((1, tq, d_model), lambda b, i, j: (b, i, 0)),          # residual q
            pl.BlockSpec((d_v, d_model), lambda b, i, j: (0, 0)),               # w_proj
            pl.BlockSpec((1, d_model), lambda b, i, j: (0, 0)),                 # b_proj
            pl.BlockSpec((1, d_model), lambda b, i, j: (0, 0)),                 # ln gamma
            pl.BlockSpec((1, d_model), lambda b, i, j: (0, 0)),                 # ln beta
        ],
        out_specs=pl.BlockSpec((1, tq, d_model), lambda b, i, j: (b, i, 0)),
        scratch_shapes=[
            pltpu.VMEM((n_head, tq, 1), jnp.float32),     # m (running max)
            pltpu.VMEM((n_head, tq, 1), jnp.float32),     # l (running denom)
            pltpu.VMEM((n_head, tq, dhv), jnp.float32),   # acc (unnormalized PV)
            pltpu.VMEM((tq, d_v), jnp.bfloat16),          # concat_head buffer
        ],
        compiler_params=pltpu.CompilerParams(
            dimension_semantics=("parallel", "parallel", "arbitrary"),
            vmem_limit_bytes=32 * 1024 * 1024,
        ),
    )(qh, kh, vh, mask_i8, q, wp, params["bp"], params["gamma"], params["beta"])


def _xavier_normal(key, fan_out, fan_in):
    std = math.sqrt(2.0 / (fan_in + fan_out))
    return std * jax.random.normal(key, (fan_out, fan_in), dtype=jnp.float32)


def init_params(key, n_head, d_model, d_k, d_v):
    kq, kk, kv_, kp, kb = jax.random.split(key, 5)
    # PyTorch Linear weight shapes are (out, in); store transposed as (in, out).
    wq = _xavier_normal(kq, d_k, d_model).T        # (d_model, d_k)
    wk = _xavier_normal(kk, d_k, d_model).T        # (d_model, d_k)
    wv = _xavier_normal(kv_, d_v, d_model).T       # (d_model, d_v)
    wp = _xavier_normal(kp, d_model, d_v).T        # (d_v, d_model)
    bound = 1.0 / math.sqrt(d_v)
    bp = jax.random.uniform(kb, (1, d_model), jnp.float32, -bound, bound)
    gamma = jnp.ones((1, d_model), jnp.float32)
    beta = jnp.zeros((1, d_model), jnp.float32)
    return dict(wq=wq, wk=wk, wv=wv, wp=wp, bp=bp, gamma=gamma, beta=beta)


def _reference(q, k, v, mask, p, n_head):
    """Pure-JAX f32 reference mirroring the PyTorch forward (eval mode)."""
    d_model = q.shape[-1]
    qh = q @ p["wq"]
    kh = k @ p["wk"]
    vh = v @ p["wv"]
    B, Lq, d_k = qh.shape
    d_v = vh.shape[-1]
    qh = qh.reshape(B, Lq, n_head, d_k // n_head).transpose(0, 2, 1, 3)
    kh = kh.reshape(B, -1, n_head, d_k // n_head).transpose(0, 2, 1, 3)
    vh = vh.reshape(B, -1, n_head, d_v // n_head).transpose(0, 2, 1, 3)
    scores = jnp.einsum("bhqd,bhkd->bhqk", qh, kh) / math.sqrt(d_model)
    scores = jnp.where(mask[:, None, :, :] != 0, -1e9, scores)
    attn = jax.nn.softmax(scores, axis=-1)
    out = jnp.einsum("bhqk,bhkd->bhqd", attn, vh)
    out = out.transpose(0, 2, 1, 3).reshape(B, Lq, d_v)
    out = out @ p["wp"] + p["bp"][0]
    x = out + q
    mean = x.mean(-1, keepdims=True)
    var = ((x - mean) ** 2).mean(-1, keepdims=True)
    return (x - mean) / jnp.sqrt(var + 1e-5) * p["gamma"][0] + p["beta"][0]


if __name__ == "__main__":
    # Small shapes consistent with the module's forward.
    B, L, d_model = 2, 8, 32
    n_head, d_k, d_v = 4, 32, 32

    key = jax.random.PRNGKey(0)
    kq, kk, kv_, kparam = jax.random.split(key, 4)
    q = jax.random.normal(kq, (B, L, d_model), dtype=jnp.float32)
    k = jax.random.normal(kk, (B, L, d_model), dtype=jnp.float32)
    v = jax.random.normal(kv_, (B, L, d_model), dtype=jnp.float32)

    # Padding-style mask: last few key positions masked in batch 1.
    col = jnp.arange(L)[None, None, :]                   # (1, 1, Lk)
    valid_len = jnp.array([L, L - 2])[:, None, None]     # (B, 1, 1)
    attn_mask = (col >= valid_len).astype(jnp.float32)   # broadcast over queries
    attn_mask = jnp.broadcast_to(attn_mask, (B, L, L))

    params = init_params(kparam, n_head, d_model, d_k, d_v)

    out = multi_head_attention(q, k, v, attn_mask, params, n_head=n_head)
    out = jax.block_until_ready(out)

    ref = _reference(q, k, v, attn_mask, params, n_head)
    assert out.shape == (B, L, d_model)
    # Tolerance relaxed vs f32 reference: MXU operands and softmax exp are bf16
    # (all softmax / LayerNorm statistics stay f32).
    assert jnp.allclose(out, ref, atol=4e-2, rtol=4e-2), "mismatch vs JAX reference"

    print("KERNEL_OK")
</pallas_src>

<mosaic_0001>
module attributes {stable_mosaic.version = 11 : i64} {
  func.func @_proj_kernel(%arg0: i32, %arg1: i32, %arg2: memref<1x8x32xf32, #tpu.memory_space<vmem>>, %arg3: memref<32x32xbf16, #tpu.memory_space<vmem>>, %arg4: memref<1x4x8x8xbf16, #tpu.memory_space<vmem>>) attributes {dimension_semantics = [#tpu.dimension_semantics<parallel>, #tpu.dimension_semantics<parallel>], iteration_bounds = array<i64: 2, 1>, scalar_prefetch = 0 : i64, scratch_operands = 0 : i64, tpu.core_type = #tpu.core_type<tc>, window_params = [{transform_indices = @transform_0, window_bounds = array<i64: 1, 8, 32>}, {pipeline_mode = #tpu.pipeline_mode<synchronous>, transform_indices = @transform_1, window_bounds = array<i64: 32, 32>}, {transform_indices = @transform_2, window_bounds = array<i64: 1, 4, 8, 8>}]} {
    %c0 = arith.constant 0 : index
    %c0_0 = arith.constant 0 : index
    %c0_1 = arith.constant 0 : index
    %0 = vector.load %arg2[%c0, %c0_0, %c0_1] : memref<1x8x32xf32, #tpu.memory_space<vmem>>, vector<1x8x32xf32>
    %1 = vector.shape_cast %0 : vector<1x8x32xf32> to vector<8x32xf32>
    %cst = arith.constant 0.176776692 : f32
    %2 = vector.broadcast %cst : f32 to vector<8x32xf32>
    %3 = arith.mulf %1, %2 : vector<8x32xf32>
    %4 = arith.truncf %3 : vector<8x32xf32> to vector<8x32xbf16>
    %c0_2 = arith.constant 0 : index
    %c0_3 = arith.constant 0 : index
    %5 = vector.load %arg3[%c0_2, %c0_3] : memref<32x32xbf16, #tpu.memory_space<vmem>>, vector<32x32xbf16>
    %cst_4 = arith.constant dense<0.000000e+00> : vector<8x32xf32>
    %6 = tpu.matmul %4, %5, %cst_4 {dimension_numbers = #tpu.dot_dimension_numbers<[1], [0], [0], [1], [0, 0, 1, 1], [], []>} : vector<8x32xbf16>, vector<32x32xbf16>, vector<8x32xf32> -> vector<8x32xf32>
    %7 = vector.extract_strided_slice %6 {offsets = [0, 0], sizes = [8, 8], strides = [1, 1]} : vector<8x32xf32> to vector<8x8xf32>
    %8 = arith.truncf %7 : vector<8x8xf32> to vector<8x8xbf16>
    %c0_5 = arith.constant 0 : index
    %c0_6 = arith.constant 0 : index
    %c0_7 = arith.constant 0 : index
    %c0_8 = arith.constant 0 : index
    %9 = vector.load %arg4[%c0_5, %c0_6, %c0_7, %c0_8] : memref<1x4x8x8xbf16, #tpu.memory_space<vmem>>, vector<1x1x8x8xbf16>
    %10 = vector.shape_cast %9 : vector<1x1x8x8xbf16> to vector<8x8xbf16>
    %11 = vector.shape_cast %8 : vector<8x8xbf16> to vector<1x1x8x8xbf16>
    tpu.vector_store %arg4[%c0_5, %c0_6, %c0_7, %c0_8], %11 {strides = array<i32>} : memref<1x4x8x8xbf16, #tpu.memory_space<vmem>>, vector<1x1x8x8xbf16>,
    %12 = vector.extract_strided_slice %6 {offsets = [0, 8], sizes = [8, 8], strides = [1, 1]} : vector<8x32xf32> to vector<8x8xf32>
    %13 = arith.truncf %12 : vector<8x8xf32> to vector<8x8xbf16>
    %c0_9 = arith.constant 0 : index
    %c1 = arith.constant 1 : index
    %c0_10 = arith.constant 0 : index
    %c0_11 = arith.constant 0 : index
    %14 = vector.load %arg4[%c0_9, %c1, %c0_10, %c0_11] : memref<1x4x8x8xbf16, #tpu.memory_space<vmem>>, vector<1x1x8x8xbf16>
    %15 = vector.shape_cast %14 : vector<1x1x8x8xbf16> to vector<8x8xbf16>
    %16 = vector.shape_cast %13 : vector<8x8xbf16> to vector<1x1x8x8xbf16>
    tpu.vector_store %arg4[%c0_9, %c1, %c0_10, %c0_11], %16 {strides = array<i32>} : memref<1x4x8x8xbf16, #tpu.memory_space<vmem>>, vector<1x1x8x8xbf16>,
    %17 = vector.extract_strided_slice %6 {offsets = [0, 16], sizes = [8, 8], strides = [1, 1]} : vector<8x32xf32> to vector<8x8xf32>
    %18 = arith.truncf %17 : vector<8x8xf32> to vector<8x8xbf16>
    %c0_12 = arith.constant 0 : index
    %c2 = arith.constant 2 : index
    %c0_13 = arith.constant 0 : index
    %c0_14 = arith.constant 0 : index
    %19 = vector.load %arg4[%c0_12, %c2, %c0_13, %c0_14] : memref<1x4x8x8xbf16, #tpu.memory_space<vmem>>, vector<1x1x8x8xbf16>
    %20 = vector.shape_cast %19 : vector<1x1x8x8xbf16> to vector<8x8xbf16>
    %21 = vector.shape_cast %18 : vector<8x8xbf16> to vector<1x1x8x8xbf16>
    tpu.vector_store %arg4[%c0_12, %c2, %c0_13, %c0_14], %21 {strides = array<i32>} : memref<1x4x8x8xbf16, #tpu.memory_space<vmem>>, vector<1x1x8x8xbf16>,
    %22 = vector.extract_strided_slice %6 {offsets = [0, 24], sizes = [8, 8], strides = [1, 1]} : vector<8x32xf32> to vector<8x8xf32>
    %23 = arith.truncf %22 : vector<8x8xf32> to vector<8x8xbf16>
    %c0_15 = arith.constant 0 : index
    %c3 = arith.constant 3 : index
    %c0_16 = arith.constant 0 : index
    %c0_17 = arith.constant 0 : index
    %24 = vector.load %arg4[%c0_15, %c3, %c0_16, %c0_17] : memref<1x4x8x8xbf16, #tpu.memory_space<vmem>>, vector<1x1x8x8xbf16>
    %25 = vector.shape_cast %24 : vector<1x1x8x8xbf16> to vector<8x8xbf16>
    %26 = vector.shape_cast %23 : vector<8x8xbf16> to vector<1x1x8x8xbf16>
    tpu.vector_store %arg4[%c0_15, %c3, %c0_16, %c0_17], %26 {strides = array<i32>} : memref<1x4x8x8xbf16, #tpu.memory_space<vmem>>, vector<1x1x8x8xbf16>,
    return
  }
  func.func @transform_0(%arg0: i32, %arg1: i32) -> (i32, i32, i32) {
    %c0_i32 = arith.constant 0 : i32
    %c0_i32_0 = arith.constant 0 : i32
    return %arg0, %arg1, %c0_i32 : i32, i32, i32
  }
  func.func @transform_1(%arg0: i32, %arg1: i32) -> (i32, i32) {
    %c0_i32 = arith.constant 0 : i32
    %c0_i32_0 = arith.constant 0 : i32
    %c0_i32_1 = arith.constant 0 : i32
    return %c0_i32, %c0_i32_0 : i32, i32
  }
  func.func @transform_2(%arg0: i32, %arg1: i32) -> (i32, i32, i32, i32) {
    %c0_i32 = arith.constant 0 : i32
    %c0_i32_0 = arith.constant 0 : i32
    %c0_i32_1 = arith.constant 0 : i32
    return %arg0, %c0_i32, %arg1, %c0_i32_0 : i32, i32, i32, i32
  }
}

</mosaic_0001>

<bundles_post_ra>
// kernel: tpu_custom_call.1
= control target key start
LH: loop header
LB: loop body
LE: loop exit
PB: predicated region body
PF: predicated region fallthrough
CT: control target
= control target key end

     0   :  { %7 = vsyncpa [#allocation3], 0  ;;  %s899_s0 = inlined_call_operand.hbm [shape: f32[2,8,32], index: 0, kind: input, shape index: {}]   ;;  %s900_s1 = inlined_call_operand.hbm [shape: bf16[32,32], index: 1, kind: input, shape index: {}]   ;;  %s901_s2 = inlined_call_operand.hbm [shape: bf16[2,4,8,8], index: 2, kind: output, shape index: {}]  }
   0x1   :  { %9 = vsyncpa [#allocation3 + $0x1], 0 }
   0x2   :  { %10 = vsyncpa [#allocation6], 0 }
   0x3   :  { %11 = vsyncpa [#allocation4], 0 }
   0x4   :  { %13 = vsyncpa [#allocation4 + $0x1], 0  ;;  %s678_s9 = smov 0   ;;  %s680_s10 = smov 0  }
   0x5   :  { %s682_s11 = smov 0   ;;  %s684_s12 = smov 0  }
   0x6   :  { %s686_s13 = smov 0   ;;  %s688_s14 = smov 0  }
   0x7 LB: > { %s385_s15 = sadd.s32 4294967295, %s649_s14   ;;  %s386_s16 = sadd.s32 4294967294, %s649_s14   ;;  %s649_s14 = sphi %s688_s14, %s19_s14   ;;  %s645_s13 = sphi %s686_s13, %s925_s13   ;;  %s641_s12 = sphi %s684_s12, %s924_s12   ;;  %s637_s11 = sphi %s682_s11, %s923_s11   ;;  %s633_s10 = sphi %s680_s10, %s922_s10   ;;  %s629_s9 = sphi %s678_s9, %s921_s9  }
   0x8   : > { %p53_p0 = scmp.ne.s32.totalorder %s633_s10, %s629_s9  ;;  %p712_p1 = scmp.eq.s32.totalorder %s385_s15, 0 }
   0x9   : > { %p716_p2 = scmp.eq.s32.totalorder %s385_s15, 1  ;;  %p106_p3 = scmp.eq.s32.totalorder %s386_s16, 1 }
   0xa   : > { %s906_s17 = scalar_select %p712_p1, 1, 0 }
   0xb   : > { %s907_s18 = scalar_select %p716_p2, 1, 0 }
   0xc   : > { %p722_p4 = por %p712_p1, %p53_p0  ;;  %p387_p5 = scmp.ge.s32.totalorder %s649_s14, 1 }
   0xd   : > { %p727_p6 = por %p106_p3, %p53_p0  ;;  %p113_p7 = scmp.lt.s32.totalorder %s649_s14, 3 }
   0xe   : > { %s908_s19 = scalar_select %p722_p4, 1, 0 }
   0xf   : > { %s909_s20 = scalar_select %p727_p6, 1, 0 }
  0x10   : > { %p732_p8 = pnand %p387_p5, %p113_p7  ;;  %s651_s22 = smov [#allocation5]  }
  0x11   : > { %s125_s23 = sshll.u32 %s651_s22, 4  ;;  %s31_s25 = sadd.s32 1, %s645_s13  ;;  %s126_s23 = int_to_ptr.vmem [resolvable:$true] %s125_s23 }
  0x12   : > { %s910_s21 = scalar_select %p732_p8, 1, 0 }
  0x13   : > { %p429_p9 = pneg %p732_p8  ;;  %s505_s28 = scalar_lea.hbm %s900_s1, 256 }
  0x14   : > { %p506_p12 = scmp.ne.s32.totalorder %s900_s1, %s505_s28  ;;  %p512_p5 = scmp.lt.u32.totalorder %s505_s28, %s900_s1 }
  0x15   : > { %p741_p11 = pnand %p429_p9, %p712_p1 }
  0x17   : > { %p507_p13 = pneg %p741_p11 }
  0x19   : > { %p508_p0 = pnand %p507_p13, %p506_p12 }
  0x1b   : > { %p509_p3 = pneg %p508_p0 }
  0x1d   : > { %p514_p7 = pnand %p512_p5, %p509_p3 }
  0x1f   : > { %517 = shalt.err (!%p514_p7)
}
  0x20   : > { %s518_s5 = scalar_lea.vmem %s126_s23, 256  ;;  %p526_p1 = scmp.lt.s32.totalorder %s126_s23, %s126_s23 }
  0x21   : > { %p519_p9 = scmp.ne.s32.totalorder %s126_s23, %s518_s5  ;;  %p527_p4 = scmp.lt.s32.totalorder %s518_s5, %s518_s5 }
  0x23   : > { %p521_p10 = pnand %p519_p9, %p507_p13  ;;  %p528_p8 = por %p527_p4, %p526_p1 }
  0x25   : > { %p522_p6 = pneg %p521_p10 }
  0x27   : > { %p529_p2 = pnand %p528_p8, %p522_p6 }
  0x29   : > { %532 = shalt.err (!%p529_p2)
}
  0x2a   : > { %s652_s6 = smov 64   ;;  %s653_s7 = smov 4  }
  0x2b   : > { %432 = dma.hbm_to_vmem [thread:$0]  (!%p741_p11), %s900_s1, 256, %s126_s23, [#allocation6], %s652_s6, %s652_s6, %s653_s7  }
  0x2c   : > { %p33_p1 = scmp.ge.s32.totalorder %s31_s25, 2  ;;  %s40_s16 = sadd.s32 1, %s637_s11 }
  0x2d   : > { %p47_p2 = scmp.ne.s32.totalorder %s637_s11, %s633_s10  ;;  %p48_p4 = scmp.eq.s32.totalorder %s649_s14, 0 }
  0x2e   : > { %s927_s25 = smov (%p33_p1, %s31_s25), 0  ;;  %p913_p8 = scmp.ne.s32.totalorder %s907_s18, 0 }
  0x2f   : > { %p768_p6 = por %p48_p4, %p47_p2  ;;  %s35_s24 = ssub.s32 %s645_s13, %s927_s25 }
  0x30   : > { %p774_p10 = por %p913_p8, %p47_p2  ;;  %p442_p12 = scmp.lt.s32.totalorder %s649_s14, 2 }
  0x31   : > { %p38_p11 = scmp.eq.s32.totalorder %s35_s24, 0  ;;  %s139_s23 = sand.u32 1, %s637_s11  }
  0x32   : > { %s390_s27 = sshll.u32 %s139_s23, 3  ;;  %s391_s29 = sshll.u32 %s645_s13, 7 }
  0x33   : > { %s783_s28 = scalar_select %p38_p11, %s637_s11, %s40_s16  }
  0x34   : > { %s789_s4 = scalar_lea.hbm %s899_s0, %s391_s29  ;;  %s143_s18 = scalar_lea.vmem [#allocation2], %s390_s27 }
  0x35   : > { %s151_s5 = sshll.u32 %s143_s18, 4  ;;  %p795_p13 = pnand %p442_p12, %p768_p6  ;;  %s791_s5 = int_to_ptr.vmem [resolvable:$true] %s151_s5 }
  0x36   : > { %s140_s7 = scalar_lea.sflag [#allocation3], %s139_s23  ;;  %s533_s8 = scalar_lea.hbm %s789_s4, 128 }
  0x37   : > { %p534_p0 = scmp.ne.s32.totalorder %s789_s4, %s533_s8  ;;  %p535_p3 = pneg %p795_p13 }
  0x38   : > { %s538_s24 = scalar_lea.hbm %s899_s0, 256  ;;  %p539_p9 = scmp.lt.u32.totalorder %s789_s4, %s899_s0 }
  0x39   : > { %p536_p5 = pnand %p535_p3, %p534_p0  ;;  %p540_p1 = scmp.lt.u32.totalorder %s538_s24, %s533_s8 }
  0x3a   : > { %p542_p4 = scmp.lt.u32.totalorder %s533_s8, %s789_s4 }
  0x3b   : > { %p537_p7 = pneg %p536_p5  ;;  %p541_p2 = por %p540_p1, %p539_p9 }
  0x3d   : > { %p543_p6 = por %p542_p4, %p541_p2 }
  0x3f   : > { %p544_p8 = pnand %p543_p6, %p537_p7 }
  0x41   : > { %547 = shalt.err (!%p544_p8)
}
  0x42   : > { %s548_s23 = scalar_lea.vmem %s791_s5, 128  ;;  %s654_s29 = smov [#allocation2]  }
  0x43   : > { %p549_p12 = scmp.ne.s32.totalorder %s791_s5, %s548_s23  ;;  %s553_s30 = sshll.u32 %s654_s29, 4  ;;  %s554_s30 = int_to_ptr.vmem [resolvable:$false] %s553_s30 }
  0x44   : > { %s555_s3 = scalar_lea.vmem %s554_s30, 256  ;;  %p556_p5 = scmp.lt.s32.totalorder %s791_s5, %s554_s30 }
  0x45   : > { %p551_p11 = pnand %p549_p12, %p535_p3  ;;  %p557_p9 = scmp.lt.s32.totalorder %s555_s3, %s548_s23 }
  0x47   : > { %p552_p0 = pneg %p551_p11  ;;  %p558_p1 = por %p557_p9, %p556_p5 }
  0x49   : > { %p559_p2 = pnand %p558_p1, %p552_p0 }
  0x4b   : > { %562 = shalt.err (!%p559_p2)
}
  0x4c   : > { %436 = dma.hbm_to_vmem [thread:$0]  (!%p795_p13), %s789_s4, 128, %s791_s5, %s140_s7  }
  0x4d   : > { %p916_p7 = scmp.ne.s32.totalorder %s910_s21, 0 }
  0x4e   : > { %s827_s18 = sand.u32 (!%p916_p7), 1, %s633_s10   ;;  %p917_p3 = scmp.ne.s32.totalorder (!%p916_p7), %s908_s19, 0 }
  0x4f   : > { %160 = sbr.rel (%p916_p7) target bundleno = 447 (0x1bf), region = 28  ;;  %s393_s8 = sshll.u32 (!%p916_p7), %s827_s18, 3 }
  0x50   : > { %s163_s15 = scalar_lea.sflag (!%p916_p7), [#allocation3], %s827_s18  ;;  %s166_s16 = scalar_lea.vmem (!%p916_p7), [#allocation2], %s393_s8 }
  0x56   : > { %616 = dma.done.wait (%p917_p3), %s163_s15, 128  }
  0x57   : > { %618 = vsyncadd (%p917_p3), %s163_s15, 4294967168  ;;  %p918_p4 = scmp.ne.s32.totalorder %s906_s17, 0 }
  0x59   : > { %620 = dma.done.wait (%p918_p4), [#allocation6], 256  }
  0x5a   : > { %622 = vsyncadd (%p918_p4), [#allocation6], 4294967040  ;;  %v655_v0 = vmov 0.0   ;;  %vm656_vm0 = vmmov 0   ;;  %v503_v1 = vld [vmem:[#allocation5] sm:$0xff]   ;;  %v504_v2 = vld [vmem:[#allocation5 + $0x8] sm:$0xff]  }
  0x5b   : > { %413 = vmatprep.subr.bf16.mxu0 %v655_v0  ;;  %417 = vmatprep.mubr.msk.bf16.mxu0 %vm656_vm0, %v655_v0  ;;  %v192_v3 = vld [vmem:[%s166_s16] sm:$0xff]  ;;  %vm211_vm1 = vcmask 261120   ;;  %s395_s19 = sshll.u32 %s827_s18, 4  ;;  %vm256_vm2 = vcmask 60416   ;;  %s657_s17 = smov 104  }
  0x5c   : > { %414 = vmatpush3.bf16.msra.mxu0 %v503_v1  ;;  %v193_v4 = vmul.f32 0.17677669, %v192_v3  ;;  %s658_s21 = smov 120   ;;  %s190_s4 = scalar_lea.vmem [#allocation7], %s395_s19 }
  0x5d   : > { %415 = vmatprep.subr.bf16.mxu0 %v655_v0  ;;  %s659_s5 = smov 112   ;;  %s291_s6 = sshll.u32 %s190_s4, 4  ;;  %s842_s6 = int_to_ptr.vmem [resolvable:$true] %s291_s6 }
  0x5e   : > { %v194_v5 = vpack.c.bf16 %v193_v4, %v193_v4  ;;  %s409_s7 = sshll.u32 %s641_s12, 8  ;;  %s277_s12 = scalar_lea.sflag [#allocation4], %s827_s18 }
  0x5f   : > { %s849_s27 = scalar_lea.hbm %s901_s2, %s409_s7  ;;  %s563_s23 = scalar_lea.vmem %s842_s6, 256 }
  0x60   : > { %416 = vmatpush3.bf16.msra.mxu0 %v504_v2  ;;  %p564_p13 = scmp.ne.s32.totalorder %s842_s6, %s563_s23  ;;  %s660_s29 = smov [#allocation7]  }
  0x61   : > { %s567_s30 = sshll.u32 %s660_s29, 4  ;;  %s568_s30 = int_to_ptr.vmem [resolvable:$false] %s567_s30 }
  0x62   : > { %p565_p6 = pnand %p564_p13, %p774_p10  ;;  %s569_s3 = scalar_lea.vmem %s568_s30, 512 }
  0x63   : > { %418 = vmatmul.mubr.msk.bf16.vlgmr.msra.gmra.mrb[0].mxu0 %vm211_vm1, %v194_v5  ;;  %p570_p12 = scmp.lt.s32.totalorder %s842_s6, %s568_s30  ;;  %p571_p11 = scmp.lt.s32.totalorder %s569_s3, %s563_s23 }
  0x64   : > { %p566_p8 = pneg %p565_p6 }
  0x65   : > { %p572_p0 = por %p571_p11, %p570_p12 }
  0x67   : > { %p573_p5 = pnand %p572_p0, %p566_p8 }
 0x136   : > { %v249_v6 = vpop.f32.mrb[0].mxu0 }
 0x137   : > { %v255_v7 = vpack.c.bf16 %v249_v6, %v249_v6  ;;  %v419_v8 = vpop.f32.mrb[1].mxu0 }
 0x138   : > { %v252_v9 = vpop.f32.mrb[2].mxu0 }
 0x139   : > { %271 = vrot.lane.b32.xlu1 %v255_v7, %s657_s17  ;;  %261 = vrot.lane.b32.xlu0 %v255_v7, %s658_s21  ;;  %v420_v10 = vpop.f32.mrb[3].mxu0  ;;  %257 = vst.msk [vmem:[%s190_s4] sm:$0xf] %vm256_vm2, %v255_v7 }
 0x13d   : > { %266 = vrot.lane.b32.xlu0 %v255_v7, %s659_s5 }
 0x1ab   : > { %v272_v11 = vpop.permute.xlu1 %271  ;;  %v262_v12 = vpop.permute.xlu0 %261 }
 0x1ac   : > { %402 = vst.msk [vmem:[%s190_s4 + $0xc] sm:$0xf] %vm256_vm2, %v272_v11  ;;  %400 = vst.msk [vmem:[%s190_s4 + $0x4] sm:$0xf] %vm256_vm2, %v262_v12 }
 0x1af   : > { %v267_v13 = vpop.permute.xlu0 %266 }
 0x1b0   : > { %401 = vst.msk [vmem:[%s190_s4 + $0x8] sm:$0xf] %vm256_vm2, %v267_v13 }
 0x1b1   : > { %576 = shalt.err (!%p573_p5)
}
 0x1b2   : > { %s577_s8 = scalar_lea.hbm %s849_s27, 256  ;;  %s581_s19 = scalar_lea.hbm %s901_s2, 512 }
 0x1b3   : > { %p578_p9 = scmp.ne.s32.totalorder %s849_s27, %s577_s8  ;;  %p582_p7 = scmp.lt.u32.totalorder %s849_s27, %s901_s2 }
 0x1b4   : > { %p583_p3 = scmp.lt.u32.totalorder %s581_s19, %s577_s8  ;;  %p585_p13 = scmp.lt.u32.totalorder %s577_s8, %s849_s27 }
 0x1b5   : > { %p579_p1 = pnand %p578_p9, %p774_p10 }
 0x1b6   : > { %p584_p4 = por %p583_p3, %p582_p7 }
 0x1b7   : > { %p580_p2 = pneg %p579_p1 }
 0x1b8   : > { %p586_p6 = por %p585_p13, %p584_p4 }
 0x1ba   : > { %p587_p8 = pnand %p586_p6, %p580_p2 }
 0x1bc   : > { %590 = shalt.err (!%p587_p8)
}
 0x1bd   : > { %s661_s4 = smov 64   ;;  %s662_s5 = smov 4  }
 0x1be   : > { %427 = dma.vmem_to_hbm [thread:$0]  (%p774_p10), %s842_s6, 256, %s849_s27, %s277_s12, %s661_s4, %s661_s4, %s662_s5  }
 0x1bf PF: > { %s306_s7 = sand.u32 1, %s629_s9   ;;  %p919_p12 = scmp.ne.s32.totalorder %s909_s20, 0 }
 0x1c0   : > { %p920_p11 = scmp.ge.s32.totalorder %s649_s14, 2  ;;  %s307_s24 = scalar_lea.sflag [#allocation4], %s306_s7 }
 0x1c2   : > { %p438_p0 = pnand %p920_p11, %p919_p12 }
 0x1c4   : > { %624 = dma.done.wait (!%p438_p0), %s307_s24, 256  }
 0x1c5   : > { %626 = vsyncadd (!%p438_p0), %s307_s24, 4294967040  ;;  %s19_s14 = sadd.s32 1, %s649_s14   ;;  %s921_s9 = smov %s633_s10 }
 0x1c6   : > { %p16_p5 = scmp.ge.s32.totalorder %s19_s14, 4   ;;  %s922_s10 = smov %s637_s11 }
 0x1c7   : > { %s923_s11 = smov %s783_s28  ;;  %s924_s12 = smov %s645_s13 }
 0x1c8   : > { %s925_s13 = smov %s927_s25  ;;  %18 = sbr.rel (!%p16_p5) target bundleno = 7 (0x7), region = 80 }
 0x1cf   :  { %312 = vsyncpa [#allocation3], 1 }
 0x1d0   :  { %314 = vsyncpa [#allocation3 + $0x1], 1 }
 0x1d1   :  { %315 = vsyncpa [#allocation6], 1 }
 0x1d2   :  { %316 = vsyncpa [#allocation4], 1 }
 0x1d3   :  { %318 = vsyncpa [#allocation4 + $0x1], 1 }

</bundles_post_ra>
